<compile_context>
chip_gen: v5e
topology: v5e:2x2
jax: 0.10.0
libtpu: 0.0.40
codegen_flags: <defaults>
</compile_context>

<pallas_src>
import functools

import jax
import jax.numpy as jnp
from jax import lax
from jax.experimental import pallas as pl
from jax.experimental.pallas import tpu as pltpu

LANES = 128            # TPU lane width
TILE_R = 1024          # default rows per tile (multiple of 32); ~5 MiB VMEM w/ pipeline bufs
_SMALL_FALLBACK = 1024  # below this many elements pure-JAX beats a kernel launch


def _pow_gamma(base, gamma):
    """base**gamma with explicit multiplies for small integer gamma (no pow/exp/log)."""
    g = float(gamma)
    if g == 0.0:
        return jnp.ones_like(base)
    if g > 0.0 and g == int(g) and int(g) <= 8:
        out = base
        for _ in range(int(g) - 1):
            out = out * base
        return out
    return base ** g


def _focal_elementwise(x, t, alpha, gamma):
    """Per-element focal loss in f32; 2 transcendentals/element; hard targets {0,1}."""
    z = (2.0 * t - 1.0) * x                     # = x if t==1 else -x
    e = jnp.exp(-jnp.abs(z))                    # in (0,1], never overflows
    bce = jnp.maximum(-z, 0.0) + jnp.log1p(e)   # stable BCE-with-logits
    one_minus_pt = jnp.where(z >= 0.0, e, 1.0) / (1.0 + e)   # = 1 - sigmoid(z)
    return alpha * _pow_gamma(one_minus_pt, gamma) * bce


def _focal_sum_kernel(x_ref, t_ref, out_ref, *, alpha, gamma,
                      n_valid, nblocks, per_core, tile_r):
    c = pl.program_id(0)          # core split (parallel)
    i = pl.program_id(1)          # block sweep (arbitrary / reduction)
    blk = c * per_core + i        # logical row-block index

    @pl.when(i == 0)
    def _init():                  # per-core partial accumulator lives in the out block
        out_ref[...] = jnp.zeros_like(out_ref)

    x = x_ref[...].astype(jnp.float32)
    t = t_ref[...].astype(jnp.float32)
    focal = _focal_elementwise(x, t, alpha, gamma)
    part_shape = (tile_r // 8, 8, LANES)   # leading-axis sum = pure VPU adds, no XLU

    @pl.when(blk < nblocks - 1)
    def _acc_full():              # interior blocks: no mask work
        out_ref[...] += focal.reshape(part_shape).sum(axis=0)

    @pl.when(blk >= nblocks - 1)
    def _acc_masked():            # last real block + clamped duplicate blocks
        row = lax.broadcasted_iota(jnp.int32, focal.shape, 0)
        lane = lax.broadcasted_iota(jnp.int32, focal.shape, 1)
        flat = (blk * tile_r + row) * LANES + lane
        masked = jnp.where(flat < n_valid, focal, 0.0)   # select → no NaN leakage
        out_ref[...] += masked.reshape(part_shape).sum(axis=0)


def _focal_none_kernel(x_ref, t_ref, o_ref, *, alpha, gamma):
    x = x_ref[...].astype(jnp.float32)
    t = t_ref[...].astype(jnp.float32)
    o_ref[...] = _focal_elementwise(x, t, alpha, gamma).astype(o_ref.dtype)


def _focal_loss_ref(inputs, targets, alpha=0.25, gamma=2.0, reduction="mean"):
    """Pure-JAX reference, mirrors the PyTorch module exactly."""
    x = inputs.astype(jnp.float32)
    t = targets.astype(jnp.float32)
    bce = jnp.maximum(x, 0.0) - x * t + jnp.log1p(jnp.exp(-jnp.abs(x)))
    pt = jnp.exp(-bce)
    focal = alpha * (1.0 - pt) ** gamma * bce
    if reduction == "mean":
        return jnp.mean(focal)
    if reduction == "sum":
        return jnp.sum(focal)
    return focal.astype(inputs.dtype)


def _sublane_granularity(dt):
    return {4: 8, 2: 16, 1: 32}.get(jnp.dtype(dt).itemsize, 8)


def focal_loss(inputs, targets, alpha=0.25, gamma=2.0, reduction="mean", *,
               tile_r=TILE_R, num_cores=2):
    """Focal loss on TPU. inputs/targets: same shape (e.g. (B,1)); targets in {0,1}."""
    assert inputs.shape == targets.shape
    orig_shape = inputs.shape
    n = 1
    for d in orig_shape:
        n *= int(d)

    # Keep targets narrow; only bool -> int8 (1 byte) for Mosaic-safe memrefs.
    if targets.dtype == jnp.bool_:
        targets = targets.astype(jnp.int8)

    # Row granularity so every block respects the dtype packing tile.
    G = max(_sublane_granularity(inputs.dtype), _sublane_granularity(targets.dtype))

    if n < max(_SMALL_FALLBACK, 2 * G * LANES):
        return _focal_loss_ref(inputs, targets, alpha, gamma, reduction)

    x = inputs.reshape(-1)
    t = targets.reshape(-1)

    # Bulk = largest prefix with a row count that's a multiple of G -> the
    # (rows, 128) reshape is a free re-layout (no jnp.pad).  Tail (< G*128 elems)
    # is handled in plain JAX below.
    rows = (n // (G * LANES)) * G
    n_bulk = rows * LANES
    tail = n - n_bulk
    if tail:
        # TODO(synk): this prefix slice still costs one copy per input; a manual-DMA
        # (memory_space=pl.ANY) path would remove it.  Zero-copy when tail == 0.
        x2 = x[:n_bulk].reshape(rows, LANES)
        t2 = t[:n_bulk].reshape(rows, LANES)
    else:
        x2 = x.reshape(rows, LANES)
        t2 = t.reshape(rows, LANES)

    tr = max(G, (int(tile_r) // G) * G)
    tr = min(tr, rows)
    nblocks = pl.cdiv(rows, tr)

    alpha_f, gamma_f = float(alpha), float(gamma)

    if reduction in ("mean", "sum"):
        ncores = num_cores if nblocks >= 2 else 1
        per_core = pl.cdiv(nblocks, ncores)

        def in_map(c, i):
            # Clamp so a possible duplicate trailing block (odd nblocks) stays
            # in-bounds; the in-kernel flat-index mask zeroes its contribution.
            return (jnp.minimum(c * per_core + i, nblocks - 1), 0)

        kernel = functools.partial(
            _focal_sum_kernel, alpha=alpha_f, gamma=gamma_f,
            n_valid=n_bulk, nblocks=nblocks, per_core=per_core, tile_r=tr)

        partials = pl.pallas_call(
            kernel,
            out_shape=jax.ShapeDtypeStruct((8 * ncores, LANES), jnp.float32),
            grid=(ncores, per_core),
            in_specs=[pl.BlockSpec((tr, LANES), in_map),
                      pl.BlockSpec((tr, LANES), in_map)],
            out_specs=pl.BlockSpec((8, LANES), lambda c, i: (c, 0)),
            compiler_params=pltpu.CompilerParams(
                dimension_semantics=("parallel", "arbitrary")),
        )(x2, t2)

        total = jnp.sum(partials)
        if tail:
            xt = x[n_bulk:].astype(jnp.float32)
            tt = t[n_bulk:].astype(jnp.float32)
            total = total + jnp.sum(_focal_elementwise(xt, tt, alpha_f, gamma_f))
        if reduction == "mean":
            total = total / n
        return total

    # reduction == 'none' (or anything else, matching the PyTorch 'else' branch)
    kernel = functools.partial(_focal_none_kernel, alpha=alpha_f, gamma=gamma_f)
    bulk_out = pl.pallas_call(
        kernel,
        out_shape=jax.ShapeDtypeStruct((rows, LANES), inputs.dtype),
        grid=(nblocks,),
        in_specs=[pl.BlockSpec((tr, LANES), lambda i: (i, 0)),
                  pl.BlockSpec((tr, LANES), lambda i: (i, 0))],
        out_specs=pl.BlockSpec((tr, LANES), lambda i: (i, 0)),
        compiler_params=pltpu.CompilerParams(dimension_semantics=("parallel",)),
    )(x2, t2)

    if tail:
        xt = x[n_bulk:].astype(jnp.float32)
        tt = t[n_bulk:].astype(jnp.float32)
        tail_out = _focal_elementwise(xt, tt, alpha_f, gamma_f).astype(inputs.dtype)
        return jnp.concatenate([bulk_out.reshape(-1), tail_out]).reshape(orig_shape)
    return bulk_out.reshape(orig_shape)   # free reshape, no slice copy


if __name__ == "__main__":
    key = jax.random.PRNGKey(0)
    k1, k2, k3, k4, k5, k6, k7, k8 = jax.random.split(key, 8)

    # 1) Kernel path with a ragged tail, ragged last row-block and an odd block
    #    count (exercises the clamped duplicate block on the 2-way core split).
    #    B=5200 -> rows=40, tail=80; tile_r=16 -> nblocks=3, grid (2,2).
    B = 5200
    logits = jax.random.normal(k1, (B, 1), dtype=jnp.float32) * 2.0
    labels = jax.random.bernoulli(k2, 0.5, (B, 1)).astype(jnp.float32)
    for red in ("mean", "sum", "none"):
        out = jax.block_until_ready(
            focal_loss(logits, labels, 0.25, 2.0, red, tile_r=16))
        ref = _focal_loss_ref(logits, labels, 0.25, 2.0, red)
        assert out.shape == ref.shape, (red, out.shape, ref.shape)
        assert jnp.allclose(out, ref, rtol=1e-4, atol=1e-5), (red, out, ref)

    # 2) Copy-free path: n multiple of G*128, even block split, no tail.
    #    B=4096 -> rows=32; tile_r=8 -> nblocks=4, grid (2,2).
    B2 = 4096
    logits2 = jax.random.normal(k3, (B2, 1), dtype=jnp.float32) * 2.0
    labels2 = jax.random.bernoulli(k4, 0.5, (B2, 1)).astype(jnp.float32)
    for red in ("mean", "none"):
        out = jax.block_until_ready(
            focal_loss(logits2, labels2, 0.25, 2.0, red, tile_r=8))
        ref = _focal_loss_ref(logits2, labels2, 0.25, 2.0, red)
        assert jnp.allclose(out, ref, rtol=1e-4, atol=1e-5), (red, out, ref)

    # 3) Narrow-dtype streaming: bf16 logits + bf16 targets, default tile.
    B3 = 8192
    logits3 = (jax.random.normal(k5, (B3, 1), dtype=jnp.float32) * 2.0).astype(jnp.bfloat16)
    labels3 = jax.random.bernoulli(k6, 0.5, (B3, 1)).astype(jnp.bfloat16)
    out3 = jax.block_until_ready(focal_loss(logits3, labels3, 0.25, 2.0, "mean"))
    ref3 = _focal_loss_ref(logits3, labels3, 0.25, 2.0, "mean")
    assert jnp.allclose(out3, ref3, rtol=1e-3, atol=1e-5), (out3, ref3)

    # 4) bool targets (streamed as int8) with a large JAX-handled tail.
    B4 = 9000
    logits4 = jax.random.normal(k7, (B4, 1), dtype=jnp.float32) * 2.0
    labels4 = jax.random.bernoulli(k8, 0.5, (B4, 1))      # bool
    out4 = jax.block_until_ready(focal_loss(logits4, labels4, 0.25, 2.0, "sum"))
    ref4 = _focal_loss_ref(logits4, labels4, 0.25, 2.0, "sum")
    assert jnp.allclose(out4, ref4, rtol=1e-4, atol=1e-3), (out4, ref4)

    # 5) Tiny-batch fallback (the module's typical (batch, 1) training usage).
    logits_s = jax.random.normal(k1, (8, 1), dtype=jnp.float32) * 2.0
    labels_s = jax.random.bernoulli(k2, 0.5, (8, 1)).astype(jnp.float32)
    out_s = jax.block_until_ready(focal_loss(logits_s, labels_s))
    ref_s = _focal_loss_ref(logits_s, labels_s)
    assert jnp.allclose(out_s, ref_s, rtol=1e-5, atol=1e-6), (out_s, ref_s)

    print("KERNEL_OK")
</pallas_src>

<mosaic_0001>
module attributes {stable_mosaic.version = 11 : i64} {
  func.func @_focal_sum_kernel(%arg0: i32, %arg1: i32, %arg2: memref<16x128xf32, #tpu.memory_space<vmem>>, %arg3: memref<16x128xf32, #tpu.memory_space<vmem>>, %arg4: memref<8x128xf32, #tpu.memory_space<vmem>>) attributes {dimension_semantics = [#tpu.dimension_semantics<parallel>, #tpu.dimension_semantics<arbitrary>], iteration_bounds = array<i64: 2, 2>, scalar_prefetch = 0 : i64, scratch_operands = 0 : i64, tpu.core_type = #tpu.core_type<tc>, window_params = [{transform_indices = @transform_0, window_bounds = array<i64: 16, 128>}, {transform_indices = @transform_1, window_bounds = array<i64: 16, 128>}, {transform_indices = @transform_2, window_bounds = array<i64: 8, 128>}]} {
    %c2_i32 = arith.constant 2 : i32
    %0 = arith.muli %arg0, %c2_i32 : i32
    %1 = arith.addi %0, %arg1 : i32
    %c0_i32 = arith.constant 0 : i32
    %2 = arith.cmpi eq, %arg1, %c0_i32 : i32
    %3 = arith.extui %2 : i1 to i32
    %c0_i32_0 = arith.constant 0 : i32
    %4 = arith.cmpi ne, %3, %c0_i32_0 : i32
    scf.if %4 {
      %cst_16 = arith.constant 0.000000e+00 : f32
      %39 = vector.broadcast %cst_16 : f32 to vector<8x128xf32>
      %c0_17 = arith.constant 0 : index
      %c0_18 = arith.constant 0 : index
      %40 = vector.load %arg4[%c0_17, %c0_18] : memref<8x128xf32, #tpu.memory_space<vmem>>, vector<8x128xf32>
      tpu.vector_store %arg4[%c0_17, %c0_18], %39 {strides = array<i32>} : memref<8x128xf32, #tpu.memory_space<vmem>>, vector<8x128xf32>,
    } else {
    }
    %c0 = arith.constant 0 : index
    %c0_1 = arith.constant 0 : index
    %5 = vector.load %arg2[%c0, %c0_1] : memref<16x128xf32, #tpu.memory_space<vmem>>, vector<16x128xf32>
    %c0_2 = arith.constant 0 : index
    %c0_3 = arith.constant 0 : index
    %6 = vector.load %arg3[%c0_2, %c0_3] : memref<16x128xf32, #tpu.memory_space<vmem>>, vector<16x128xf32>
    %cst = arith.constant 2.000000e+00 : f32
    %7 = vector.broadcast %cst : f32 to vector<16x128xf32>
    %8 = arith.mulf %7, %6 : vector<16x128xf32>
    %cst_4 = arith.constant 1.000000e+00 : f32
    %9 = vector.broadcast %cst_4 : f32 to vector<16x128xf32>
    %10 = arith.subf %8, %9 : vector<16x128xf32>
    %11 = arith.mulf %10, %5 : vector<16x128xf32>
    %12 = math.absf %11 : vector<16x128xf32>
    %cst_5 = arith.constant 0.000000e+00 : f32
    %13 = vector.broadcast %cst_5 : f32 to vector<16x128xf32>
    %14 = arith.subf %13, %12 : vector<16x128xf32>
    %15 = math.exp %14 : vector<16x128xf32>
    %cst_6 = arith.constant 0.000000e+00 : f32
    %16 = vector.broadcast %cst_6 : f32 to vector<16x128xf32>
    %17 = arith.subf %16, %11 : vector<16x128xf32>
    %cst_7 = arith.constant 0.000000e+00 : f32
    %18 = vector.broadcast %cst_7 : f32 to vector<16x128xf32>
    %19 = arith.maximumf %17, %18 : vector<16x128xf32>
    %20 = math.log1p %15 : vector<16x128xf32>
    %21 = arith.addf %19, %20 : vector<16x128xf32>
    %cst_8 = arith.constant 0.000000e+00 : f32
    %22 = vector.broadcast %cst_8 : f32 to vector<16x128xf32>
    %23 = arith.cmpf oge, %11, %22 : vector<16x128xf32>
    %cst_9 = arith.constant 1.000000e+00 : f32
    %24 = vector.broadcast %cst_9 : f32 to vector<16x128xf32>
    %25 = arith.select %23, %15, %24 : vector<16x128xi1>, vector<16x128xf32>
    %cst_10 = arith.constant 1.000000e+00 : f32
    %26 = vector.broadcast %cst_10 : f32 to vector<16x128xf32>
    %27 = arith.addf %26, %15 : vector<16x128xf32>
    %28 = arith.divf %25, %27 : vector<16x128xf32>
    %29 = arith.mulf %28, %28 : vector<16x128xf32>
    %cst_11 = arith.constant 2.500000e-01 : f32
    %30 = vector.broadcast %cst_11 : f32 to vector<16x128xf32>
    %31 = arith.mulf %30, %29 : vector<16x128xf32>
    %32 = arith.mulf %31, %21 : vector<16x128xf32>
    %c2_i32_12 = arith.constant 2 : i32
    %33 = arith.cmpi slt, %1, %c2_i32_12 : i32
    %34 = arith.extui %33 : i1 to i32
    %c0_i32_13 = arith.constant 0 : i32
    %35 = arith.cmpi ne, %34, %c0_i32_13 : i32
    scf.if %35 {
      %c0_16 = arith.constant 0 : index
      %c0_17 = arith.constant 0 : index
      %39 = vector.load %arg4[%c0_16, %c0_17] : memref<8x128xf32, #tpu.memory_space<vmem>>, vector<8x128xf32>
      %40 = vector.shape_cast %32 : vector<16x128xf32> to vector<2x8x128xf32>
      %cst_18 = arith.constant dense<0.000000e+00> : vector<8x128xf32>
      %41 = vector.multi_reduction <add>, %40, %cst_18 [0] : vector<2x8x128xf32> to vector<8x128xf32>
      %42 = arith.addf %39, %41 : vector<8x128xf32>
      %c0_19 = arith.constant 0 : index
      %c0_20 = arith.constant 0 : index
      %43 = vector.load %arg4[%c0_19, %c0_20] : memref<8x128xf32, #tpu.memory_space<vmem>>, vector<8x128xf32>
      tpu.vector_store %arg4[%c0_19, %c0_20], %42 {strides = array<i32>} : memref<8x128xf32, #tpu.memory_space<vmem>>, vector<8x128xf32>,
    } else {
    }
    %c2_i32_14 = arith.constant 2 : i32
    %36 = arith.cmpi sge, %1, %c2_i32_14 : i32
    %37 = arith.extui %36 : i1 to i32
    %c0_i32_15 = arith.constant 0 : i32
    %38 = arith.cmpi ne, %37, %c0_i32_15 : i32
    scf.if %38 {
      %39 = tpu.iota {dimensions = array<i32: 0>} : vector<16x128xi32>
      %40 = tpu.iota {dimensions = array<i32: 1>} : vector<16x128xi32>
      %c16_i32 = arith.constant 16 : i32
      %41 = arith.muli %1, %c16_i32 : i32
      %42 = vector.broadcast %41 : i32 to vector<16x128xi32>
      %43 = arith.addi %42, %39 : vector<16x128xi32>
      %c128_i32 = arith.constant 128 : i32
      %44 = vector.broadcast %c128_i32 : i32 to vector<16x128xi32>
      %45 = arith.muli %43, %44 : vector<16x128xi32>
      %46 = arith.addi %45, %40 : vector<16x128xi32>
      %c5120_i32 = arith.constant 5120 : i32
      %47 = vector.broadcast %c5120_i32 : i32 to vector<16x128xi32>
      %48 = arith.cmpi slt, %46, %47 : vector<16x128xi32>
      %cst_16 = arith.constant 0.000000e+00 : f32
      %49 = vector.broadcast %cst_16 : f32 to vector<16x128xf32>
      %50 = arith.select %48, %32, %49 : vector<16x128xi1>, vector<16x128xf32>
      %c0_17 = arith.constant 0 : index
      %c0_18 = arith.constant 0 : index
      %51 = vector.load %arg4[%c0_17, %c0_18] : memref<8x128xf32, #tpu.memory_space<vmem>>, vector<8x128xf32>
      %52 = vector.shape_cast %50 : vector<16x128xf32> to vector<2x8x128xf32>
      %cst_19 = arith.constant dense<0.000000e+00> : vector<8x128xf32>
      %53 = vector.multi_reduction <add>, %52, %cst_19 [0] : vector<2x8x128xf32> to vector<8x128xf32>
      %54 = arith.addf %51, %53 : vector<8x128xf32>
      %c0_20 = arith.constant 0 : index
      %c0_21 = arith.constant 0 : index
      %55 = vector.load %arg4[%c0_20, %c0_21] : memref<8x128xf32, #tpu.memory_space<vmem>>, vector<8x128xf32>
      tpu.vector_store %arg4[%c0_20, %c0_21], %54 {strides = array<i32>} : memref<8x128xf32, #tpu.memory_space<vmem>>, vector<8x128xf32>,
    } else {
    }
    return
  }
  func.func @transform_0(%arg0: i32, %arg1: i32) -> (i32, i32) {
    %c2_i32 = arith.constant 2 : i32
    %0 = arith.muli %arg0, %c2_i32 : i32
    %1 = arith.addi %0, %arg1 : i32
    %c2_i32_0 = arith.constant 2 : i32
    %2 = arith.minsi %1, %c2_i32_0 : i32
    %c0_i32 = arith.constant 0 : i32
    %c0_i32_1 = arith.constant 0 : i32
    return %2, %c0_i32 : i32, i32
  }
  func.func @transform_1(%arg0: i32, %arg1: i32) -> (i32, i32) {
    %c2_i32 = arith.constant 2 : i32
    %0 = arith.muli %arg0, %c2_i32 : i32
    %1 = arith.addi %0, %arg1 : i32
    %c2_i32_0 = arith.constant 2 : i32
    %2 = arith.minsi %1, %c2_i32_0 : i32
    %c0_i32 = arith.constant 0 : i32
    %c0_i32_1 = arith.constant 0 : i32
    return %2, %c0_i32 : i32, i32
  }
  func.func @transform_2(%arg0: i32, %arg1: i32) -> (i32, i32) {
    %c0_i32 = arith.constant 0 : i32
    %c0_i32_0 = arith.constant 0 : i32
    return %arg0, %c0_i32 : i32, i32
  }
}

</mosaic_0001>

<bundles_post_ra>
// kernel: tpu_custom_call.1
= control target key start
LH: loop header
LB: loop body
LE: loop exit
PB: predicated region body
PF: predicated region fallthrough
CT: control target
= control target key end

     0   :  { %s1219_s0 = inlined_call_operand.hbm [shape: f32[40,128], index: 0, kind: input, shape index: {}]   ;;  %s1220_s1 = inlined_call_operand.hbm [shape: f32[40,128], index: 1, kind: input, shape index: {}]   ;;  %s1221_s2 = inlined_call_operand.hbm [shape: f32[16,128], index: 2, kind: output, shape index: {}]  }
   0x1   :  { %1227 = sst [smem:[#allocation16_spill]] %s1219_s0 }
   0x2   :  { %7 = vsyncpa [#allocation3], 0 }
   0x3   :  { %9 = vsyncpa [#allocation3 + $0x1], 0 }
   0x4   :  { %10 = vsyncpa [#allocation6], 0 }
   0x5   :  { %12 = vsyncpa [#allocation6 + $0x1], 0 }
   0x6   :  { %13 = vsyncpa [#allocation4], 0 }
   0x7   :  { %15 = vsyncpa [#allocation4 + $0x1], 0  ;;  %s901_s9 = smov 0   ;;  %s903_s10 = smov 0  }
   0x8   :  { %s905_s11 = smov 0   ;;  %s907_s12 = smov 0  }
   0x9   :  { %s909_s13 = smov 0   ;;  %s911_s14 = smov 0  }
   0xa   :  { %s913_s15 = smov 0   ;;  %s915_s16 = smov 0  }
   0xb   :  { %s917_s17 = smov 0   ;;  %s919_s18 = smov 0  }
   0xc   :  { %s921_s19 = smov 0  }
   0xd LB: > { %1228 = sst [smem:[#allocation11_spill]] %s869_s17  ;;  %s518_s20 = sadd.s32 4294967295, %s877_s19   ;;  %s877_s19 = sphi %s921_s19, %s21_s19   ;;  %s873_s18 = sphi %s919_s18, %s1253_s18   ;;  %s869_s17 = sphi %s917_s17, %s1252_s17   ;;  %s865_s16 = sphi %s915_s16, %s1251_s16   ;;  %s861_s15 = sphi %s913_s15, %s1250_s15   ;;  %s857_s14 = sphi %s911_s14, %s1259_s14   ;;  %s853_s13 = sphi %s909_s13, %s1258_s13   ;;  %s849_s12 = sphi %s907_s12, %s1257_s12   ;;  %s845_s11 = sphi %s905_s11, %s1256_s11   ;;  %s841_s10 = sphi %s903_s10, %s1255_s10   ;;  %s837_s9 = sphi %s901_s9, %s1254_s9  }
   0xe   : > { %1229 = sst [smem:[#allocation12_spill]] %s873_s18  ;;  %s519_s21 = sadd.s32 4294967294, %s877_s19  }
   0xf   : > { %s30_s22 = sadd.s32 1, %s869_s17  ;;  %s33_s23 = sadd.s32 1, %s873_s18 }
  0x10   : > { %p31_p0 = scmp.ge.s32.totalorder %s30_s22, 2  ;;  %s520_s24 = sshll.u32 %s873_s18, 1 }
  0x11   : > { %s38_s25 = sadd.s32 %s869_s17, %s520_s24  ;;  %s48_s26 = sadd.s32 1, %s857_s14 }
  0x12   : > { %s1261_s22 = smov (%p31_p0, %s30_s22), 0  ;;  %s1263_s23 = smov (!%p31_p0, %s33_s23), %s873_s18 }
  0x13   : > { %1230 = sst [smem:[#allocation13_spill]] %s1261_s22  ;;  %p39_p1 = scmp.lt.s32.totalorder %s38_s25, 2 }
  0x14   : > { %p55_p2 = scmp.ne.s32.totalorder %s857_s14, %s853_s13  ;;  %p35_p3 = scmp.ge.s32.totalorder %s1263_s23, 2 }
  0x15   : > { %p56_p4 = scmp.eq.s32.totalorder %s877_s19, 0  ;;  %s1265_s25 = smov (!%p39_p1, %s38_s25), 2 }
  0x16   : > { %s1267_s23 = smov (%p35_p3, %s1263_s23), 0  ;;  %p61_p6 = scmp.ne.s32.totalorder %s853_s13, %s849_s12 }
  0x17   : > { %1231 = sst [smem:[#allocation14_spill]] %s1267_s23  ;;  %p973_p5 = por %p56_p4, %p55_p2 }
  0x18   : > { %s521_s28 = sshll.u32 %s1267_s23, 1  ;;  %p62_p7 = scmp.eq.s32.totalorder %s518_s20, 0 }
  0x19   : > { %s42_s29 = sadd.s32 %s521_s28, %s1261_s22  ;;  %s105_s30 = ssub.s32 %s873_s18, %s1267_s23 }
  0x1a   : > { %p43_p8 = scmp.lt.s32.totalorder %s42_s29, 2  ;;  %p985_p9 = por %p62_p7, %p61_p6 }
  0x1b   : > { %p106_p10 = scmp.eq.s32.totalorder %s105_s30, 0  ;;  %s108_s4 = sadd.s32 1, %s845_s11 }
  0x1c   : > { %s1269_s29 = smov (!%p43_p8, %s42_s29), 2  ;;  %p118_p11 = scmp.ne.s32.totalorder %s845_s11, %s841_s10 }
  0x1d   : > { %s991_s5 = scalar_select %p106_p10, %s845_s11, %s108_s4  }
  0x1e   : > { %s45_s6 = ssub.s32 %s1265_s25, %s1269_s29  ;;  %p119_p13 = scmp.eq.s32.totalorder %s518_s20, 3 }
  0x1f   : > { %p46_p12 = scmp.eq.s32.totalorder %s45_s6, 0  ;;  %p124_p0 = scmp.ne.s32.totalorder %s841_s10, %s837_s9 }
  0x20   : > { %p125_p1 = scmp.eq.s32.totalorder %s519_s21, 3  ;;  %p1005_p2 = por %p119_p13, %p118_p11 }
  0x21   : > { %s1003_s7 = scalar_select %p46_p12, %s857_s14, %s48_s26  }
  0x22   : > { %p1009_p3 = por %p125_p1, %p124_p0  ;;  %p525_p4 = scmp.ge.s32.totalorder %s877_s19, 4 }
  0x23   : > { %1234 = sst [smem:[#allocation15_spill]] %s1003_s7 }
  0x24   : > { %141 = sbr.rel (%p525_p4) target bundleno = 120 (0x78), region = 16 }
  0x29   : > { %144 = sbr.rel (!%p973_p5) target bundleno = 84 (0x54), region = 20  ;;  %s145_s20 = sand.u32 (%p973_p5), 1, %s857_s14  }
  0x2a   : > { %s528_s21 = sshll.u32 (%p973_p5), %s1265_s25, 1  ;;  %s526_s24 = sshll.u32 (%p973_p5), %s145_s20, 4 }
  0x2b   : > { %s155_s26 = ssub.s32 (%p973_p5), 5, %s528_s21  ;;  %s1021_s4 = scalar_lea.sflag (%p973_p5), [#allocation3], %s145_s20 }
  0x2c   : > { %p156_p6 = scmp.lt.s32.totalorder (%p973_p5), %s155_s26, 2  ;;  %s149_s6 = scalar_lea.vmem (%p973_p5), [#allocation2], %s526_s24 }
  0x2e   : > { %s1271_s26 = smov (!%p156_p6, %s155_s26), 2 }
  0x2f   : > { %s529_s28 = sshll.u32 %s1271_s26, 3 }
  0x30   : > { %s159_s29 = ssub.s32 16, %s529_s28 }
  0x31   : > { %s160_s30 = sshll.u32 %s159_s29, 4 }
  0x32   : > { %161 = vsyncadd %s1021_s4, %s160_s30  ;;  %p1024_p7 = scmp.ne.s32.totalorder %s529_s28, 0  ;;  %s557_s21 = sshll.u32 %s1265_s25, 4 }
  0x33   : > { %s1238_s0 = sld [smem:[#allocation16_spill]]  ;;  %s1032_s7 = sshll.u32 %s149_s6, 4  ;;  %s169_s7 = int_to_ptr.vmem [resolvable:$true] %s1032_s7 }
  0x34   : > { %s1226_s24 = sshll.u32 %s1271_s26, 7 }
  0x35   : > { %s675_s28 = sshrl.u32 %s1226_s24, 4 }
  0x39   : > { %s164_s17 = scalar_lea.hbm %s1238_s0, %s557_s21  ;;  %s684_s6 = scalar_lea.hbm %s1238_s0, 40 }
  0x3a   : > { %s166_s20 = sshll.u32 %s164_s17, 4  ;;  %s1035_s20 = int_to_ptr.hbm [resolvable:$true] %s166_s20 }
  0x3b   : > { %s673_s29 = sshra.s32 %s1035_s20, 4  ;;  %s674_s29 = int_to_ptr.hbm [resolvable:$true] %s673_s29 }
  0x3c   : > { %s680_s30 = scalar_lea.hbm %s674_s29, %s675_s28 }
  0x3d   : > { %p681_p8 = scmp.ne.s32.totalorder %s674_s29, %s680_s30  ;;  %p686_p12 = scmp.lt.s32.totalorder %s684_s6, %s680_s30 }
  0x3f   : > { %p682_p10 = pnand %p681_p8, %p1024_p7 }
  0x41   : > { %p683_p11 = pneg %p682_p10 }
  0x43   : > { %p688_p13 = pnand %p686_p12, %p683_p11 }
  0x45   : > { %691 = shalt.err (!%p688_p13)
}
  0x46   : > { %s692_s17 = sshra.s32 %s169_s7, 4  ;;  %s879_s29 = smov [#allocation2]   ;;  %s693_s17 = int_to_ptr.vmem [resolvable:$true] %s692_s17 }
  0x47   : > { %s699_s21 = scalar_lea.vmem %s693_s17, %s675_s28  ;;  %s703_s24 = scalar_lea.vmem %s879_s29, 32 }
  0x48   : > { %p700_p0 = scmp.ne.s32.totalorder %s693_s17, %s699_s21  ;;  %p705_p6 = scmp.lt.s32.totalorder %s703_s24, %s699_s21 }
  0x4a   : > { %p701_p1 = pnand %p700_p0, %p1024_p7 }
  0x4c   : > { %p702_p4 = pneg %p701_p1 }
  0x4e   : > { %p707_p8 = pnand %p705_p6, %p702_p4 }
  0x50   : > { %710 = shalt.err (!%p707_p8)
}
  0x51   : > { %s880_s18 = smov 128   ;;  %s881_s30 = smov 8  }
  0x52   : > { %s1239_s22 = sshll.u32 %s1271_s26, 7 }
  0x53   : > { %174 = dma.hbm_to_vmem [thread:$0]  (%p1024_p7), %s1035_s20, %s1239_s22, %s169_s7, %s1021_s4, %s880_s18, %s880_s18, %s881_s30  }
  0x54 PF: > { %177 = sbr.rel (!%p973_p5) target bundleno = 120 (0x78), region = 24  ;;  %s178_s24 = sand.u32 (%p973_p5), 1, %s857_s14  }
  0x55   : > { %s536_s28 = sshll.u32 (%p973_p5), %s1265_s25, 1  ;;  %s534_s6 = sshll.u32 (%p973_p5), %s178_s24, 4 }
  0x56   : > { %s188_s17 = ssub.s32 (%p973_p5), 5, %s536_s28  ;;  %s1065_s0 = scalar_lea.sflag (%p973_p5), [#allocation6], %s178_s24 }
  0x57   : > { %p189_p10 = scmp.lt.s32.totalorder (%p973_p5), %s188_s17, 2  ;;  %s182_s7 = scalar_lea.vmem (%p973_p5), [#allocation5], %s534_s6 }
  0x59   : > { %s1273_s17 = smov (!%p189_p10, %s188_s17), 2 }
  0x5a   : > { %s537_s21 = sshll.u32 %s1273_s17, 3 }
  0x5b   : > { %s192_s29 = ssub.s32 16, %s537_s21 }
  0x5c   : > { %s193_s23 = sshll.u32 %s192_s29, 4 }
  0x5d   : > { %194 = vsyncadd %s1065_s0, %s193_s23  ;;  %p1068_p5 = scmp.ne.s32.totalorder %s537_s21, 0  ;;  %s558_s26 = sshll.u32 %s1265_s25, 4 }
  0x5e   : > { %s197_s18 = scalar_lea.hbm %s1220_s1, %s558_s26  ;;  %s1076_s30 = sshll.u32 %s182_s7, 4  ;;  %s202_s30 = int_to_ptr.vmem [resolvable:$true] %s1076_s30 }
  0x5f   : > { %s199_s22 = sshll.u32 %s197_s18, 4  ;;  %s541_s24 = sshll.u32 %s1273_s17, 7  ;;  %s1079_s22 = int_to_ptr.hbm [resolvable:$true] %s199_s22 }
  0x60   : > { %s712_s28 = sshra.s32 %s1079_s22, 4  ;;  %s714_s6 = sshrl.u32 %s541_s24, 4  ;;  %s713_s28 = int_to_ptr.hbm [resolvable:$true] %s712_s28 }
  0x61   : > { %s719_s21 = scalar_lea.hbm %s713_s28, %s714_s6  ;;  %s723_s23 = scalar_lea.hbm %s1220_s1, 40 }
  0x62   : > { %p720_p7 = scmp.ne.s32.totalorder %s713_s28, %s719_s21  ;;  %p725_p13 = scmp.lt.s32.totalorder %s723_s23, %s719_s21 }
  0x64   : > { %p721_p11 = pnand %p720_p7, %p1068_p5 }
  0x66   : > { %p722_p12 = pneg %p721_p11 }
  0x68   : > { %p727_p0 = pnand %p725_p13, %p722_p12 }
  0x6a   : > { %730 = shalt.err (!%p727_p0)
}
  0x6b   : > { %s731_s7 = sshra.s32 %s202_s30, 4  ;;  %s882_s4 = smov [#allocation5]   ;;  %s732_s7 = int_to_ptr.vmem [resolvable:$true] %s731_s7 }
  0x6c   : > { %s738_s26 = scalar_lea.vmem %s732_s7, %s714_s6  ;;  %s742_s20 = scalar_lea.vmem %s882_s4, 32 }
  0x6d   : > { %p739_p1 = scmp.ne.s32.totalorder %s732_s7, %s738_s26  ;;  %p744_p8 = scmp.lt.s32.totalorder %s742_s20, %s738_s26 }
  0x6f   : > { %p740_p4 = pnand %p739_p1, %p1068_p5 }
  0x71   : > { %p741_p6 = pneg %p740_p4 }
  0x73   : > { %p746_p10 = pnand %p744_p8, %p741_p6 }
  0x75   : > { %749 = shalt.err (!%p746_p10)
}
  0x76   : > { %s883_s18 = smov 128   ;;  %s884_s28 = smov 8  }
  0x77   : > { %207 = dma.hbm_to_vmem [thread:$0]  (%p1068_p5), %s1079_s22, %s541_s24, %s202_s30, %s1065_s0, %s883_s18, %s883_s18, %s884_s28  }
  0x78 PF: > { %p542_p7 = scmp.ge.s32.totalorder %s877_s19, 1  ;;  %p209_p11 = scmp.lt.s32.totalorder %s877_s19, 5 }
  0x7a   : > { %p210_p12 = pnand %p542_p7, %p209_p11 }
  0x7b   : > { %s215_s6 = sand.u32 (!%p210_p12), 1, %s853_s13  }
  0x7c   : > { %213 = sbr.rel (%p210_p12) target bundleno = 237 (0xed), region = 28  ;;  %s543_s21 = sshll.u32 (!%p210_p12), %s215_s6, 4 }
  0x7d   : > { %s216_s25 = scalar_lea.sflag (!%p210_p12), [#allocation3], %s215_s6  ;;  %s219_s29 = scalar_lea.vmem (!%p210_p12), [#allocation2], %s543_s21 }
  0x81   : > { %824 = dma.done.wait (%p985_p9), %s216_s25, 256  }
  0x82   : > { %826 = vsyncadd (%p985_p9), %s216_s25, 4294967040  ;;  %s226_s0 = scalar_lea.sflag [#allocation6], %s215_s6  ;;  %s229_s17 = scalar_lea.vmem [#allocation5], %s543_s21 }
  0x83   : > { %828 = dma.done.wait (%p985_p9), %s226_s0, 256  }
  0x84   : > { %830 = vsyncadd (%p985_p9), %s226_s0, 4294967040  ;;  %s253_s27 = sand.u32 1, %s841_s10   ;;  %s546_s30 = sshll.u32 %s865_s16, 1 }
  0x85   : > { %s545_s22 = sshll.u32 %s253_s27, 3  ;;  %s1118_s24 = sadd.s32 %s861_s15, %s546_s30 }
  0x86   : > { %s1120_s23 = scalar_lea.vmem [#allocation7], %s545_s22  ;;  %p547_p5 = scmp.ne.s32.totalorder %s861_s15, 0 }
  0x88   : > { %279 = sbr.rel (%p547_p5) target bundleno = 143 (0x8f), region = 40 }
  0x8d   : > { %v885_v0 = vmov 0.0  }
  0x8e   : > { %280 = vst [vmem:[%s1120_s23] sm:$0xff] %v885_v0 }
  0x8f PF: > { %v283_v1 = vld [vmem:[%s229_s17] sm:$0xff]  ;;  %v284_v2 = vld [vmem:[%s229_s17 + $0x8] sm:$0xff]  ;;  %p550_p9 = scmp.ge.s32.totalorder %s1118_s24, 2 }
  0x90   : > { %v285_v3 = vmul.f32 2.0, %v283_v1  ;;  %v281_v4 = vld [vmem:[%s219_s29] sm:$0xff]  ;;  %v286_v5 = vmul.f32 2.0, %v284_v2  ;;  %v282_v6 = vld [vmem:[%s219_s29 + $0x8] sm:$0xff] }
  0x92   : > { %v548_v7 = vadd.f32 -1.0, %v285_v3  ;;  %v549_v8 = vadd.f32 -1.0, %v286_v5 }
  0x94   : > { %v289_v9 = vmul.f32 %v548_v7, %v281_v4  ;;  %v1124_v10 = vmul.f32 %v549_v8, %v282_v6 }
  0x96   : > { %v291_v11 = vand.u32 2147483647, %v289_v9  ;;  %v292_v12 = vand.u32 2147483647, %v1124_v10  ;;  %v299_v24 = vsub.f32 0.0, %v289_v9  ;;  %v300_v25 = vsub.f32 0.0, %v1124_v10 }
  0x97   : > { %vm323_vm0 = vcmp.ge.f32.partialorder %v289_v9, 0.0  ;;  %vm324_vm6 = vcmp.ge.f32.partialorder %v1124_v10, 0.0 }
  0x98   : > { %v293_v13 = vsub.f32 0.0, %v291_v11  ;;  %v294_v14 = vsub.f32 0.0, %v292_v12  ;;  %v301_v56 = vmax.f32 %v299_v24, 0.0  ;;  %v302_v59 = vmax.f32 %v300_v25, 0.0 }
  0x9a   : > { %v295_v15 = vmul.f32 1.442695, %v293_v13  ;;  %v297_v16 = vmul.f32 1.442695, %v294_v14 }
  0x9c   : > { %661 = vpow2.f32 %v295_v15 }
  0x9d   : > { %663 = vpow2.f32 %v297_v16 }
  0xa2   : > { %v662_v17 = vpop.eup %661 }
  0xa3   : > { %v664_v18 = vpop.eup %663  ;;  %v303_v19 = vadd.f32 1.0, %v662_v17  ;;  %v306_v21 = vmul.f32 -0.5, %v662_v17  ;;  %v309_v28 = vand.u32 2147483647, %v662_v17  ;;  %v325_v54 = vsel %vm323_vm0, %v662_v17, 1.0 }
  0xa4   : > { %v312_v20 = vadd.f32 1.0, %v664_v18  ;;  %v315_v22 = vmul.f32 -0.5, %v664_v18  ;;  %v318_v29 = vand.u32 2147483647, %v664_v18  ;;  %v326_v57 = vsel %vm324_vm6, %v664_v18, 1.0 }
  0xa5   : > { %665 = vrcp.f32 %v303_v19  ;;  %v307_v27 = vadd.f32 1.0, %v306_v21  ;;  %vm334_vm1 = vweird.f32 %v303_v19  ;;  %v340_v32 = vand.u32 2147483648, %v303_v19 }
  0xa6   : > { %667 = vrcp.f32 %v312_v20  ;;  %v316_v31 = vadd.f32 1.0, %v315_v22  ;;  %v338_v36 = vand.u32 2147483647, %v303_v19  ;;  %v355_v37 = vand.u32 2147483648, %v312_v20 }
  0xa7   : > { %669 = vlog2.f32 %v303_v19  ;;  %vm349_vm3 = vweird.f32 %v312_v20  ;;  %v353_v40 = vand.u32 2147483647, %v312_v20  ;;  %v308_v41 = vmul.f32 %v662_v17, %v307_v27 }
  0xa8   : > { %671 = vlog2.f32 %v312_v20  ;;  %vm1128_vm5 = vcmp.lt.f32.partialorder %v309_v28, 0.0004427343  ;;  %v317_v45 = vmul.f32 %v664_v18, %v316_v31  ;;  %v341_v47 = vor.u32 1.1754944e-38, %v340_v32 }
  0xa9   : > { %vm339_vm8 = vcmp.eq.f32.partialorder %v338_v36, 8.507059e+37  ;;  %v356_v52 = vor.u32 1.1754944e-38, %v355_v37  ;;  %vm1143_vm10 = vcmp.lt.f32.partialorder %v318_v29, 0.0004427343  ;;  %vm354_vm11 = vcmp.eq.f32.partialorder %v353_v40, 8.507059e+37 }
  0xab   : > { %v666_v23 = vpop.eup %665 }
  0xac   : > { %v668_v26 = vpop.eup %667  ;;  %v330_v30 = vmul.f32 %v666_v23, %v303_v19  ;;  %vm335_vm2 = vweird.f32 %v666_v23 }
  0xad   : > { %v345_v33 = vmul.f32 %v668_v26, %v312_v20  ;;  %v670_v34 = vpop.eup %669  ;;  %vm350_vm4 = vweird.f32 %v668_v26  ;;  %vm1134_vm7 = vmor %vm334_vm1, %vm335_vm2 }
  0xae   : > { %v331_v35 = vsub.f32 1.0, %v330_v30  ;;  %v672_v38 = vpop.eup %671  ;;  %v305_v44 = vmul.f32 0.6931472, %v670_v34  ;;  %vm1139_vm9 = vmor %vm349_vm3, %vm350_vm4 }
  0xaf   : > { %v346_v39 = vsub.f32 1.0, %v345_v33  ;;  %v314_v49 = vmul.f32 0.6931472, %v672_v38 }
  0xb0   : > { %v332_v43 = vmul.f32 %v666_v23, %v331_v35  ;;  %v311_v60 = vsel %vm1128_vm5, %v308_v41, %v305_v44 }
  0xb1   : > { %v347_v48 = vmul.f32 %v668_v26, %v346_v39  ;;  %v320_v63 = vsel %vm1143_vm10, %v317_v45, %v314_v49  ;;  %v321_v3 = vadd.f32 %v311_v60, %v301_v56 }
  0xb2   : > { %v333_v50 = vadd.f32 %v666_v23, %v332_v43  ;;  %v322_v5 = vadd.f32 %v320_v63, %v302_v59 }
  0xb3   : > { %v348_v55 = vadd.f32 %v668_v26, %v347_v48 }
  0xb4   : > { %v337_v58 = vsel %vm1134_vm7, %v666_v23, %v333_v50 }
  0xb5   : > { %v342_v61 = vsel %vm339_vm8, %v341_v47, %v337_v58  ;;  %v352_v62 = vsel %vm1139_vm9, %v668_v26, %v348_v55 }
  0xb6   : > { %v343_v0 = vmul.f32 %v342_v61, %v325_v54  ;;  %v357_v1 = vsel %vm354_vm11, %v356_v52, %v352_v62 }
  0xb7   : > { %v358_v2 = vmul.f32 %v357_v1, %v326_v57 }
  0xb8   : > { %v359_v4 = vmul.f32 %v343_v0, %v343_v0 }
  0xb9   : > { %v360_v6 = vmul.f32 %v358_v2, %v358_v2  ;;  %368 = sbr.rel (%p550_p9) target bundleno = 196 (0xc4), region = 44 }
  0xba   : > { %v361_v7 = vmul.f32 0.25, %v359_v4 }
  0xbb   : > { %v362_v8 = vmul.f32 0.25, %v360_v6 }
  0xbc   : > { %v363_v9 = vmul.f32 %v361_v7, %v321_v3 }
  0xbd   : > { %v364_v10 = vmul.f32 %v362_v8, %v322_v5 }
  0xbe   : > { %v369_v11 = vld [vmem:[%s1120_s23] sm:$0xff] }
  0xbf   : > { %v370_v12 = vadd.f32 %v364_v10, %v363_v9 }
  0xc1   : > { %v371_v13 = vadd.f32 %v370_v12, %v369_v11 }
  0xc3   : > { %372 = vst [vmem:[%s1120_s23] sm:$0xff] %v371_v13 }
  0xc4 PF: > { %p551_p13 = scmp.lt.s32.totalorder %s1118_s24, 2 }
  0xc5   : > { %s552_s15 = sshll.u32 (!%p551_p13), %s1118_s24, 4 }
  0xc6   : > { %376 = sbr.rel (%p551_p13) target bundleno = 222 (0xde), region = 48 }
  0xcb   : > { %v377_v14 = vlaneseq  ;;  %v383_v15 = vstv %s552_s15  ;;  %v394_v27 = vld [vmem:[%s1120_s23] sm:$0xff] }
  0xcd   : > { %v378_v16 = vshrl.u32 %v377_v14, 7  ;;  %v381_v18 = vand.u32 127, %v377_v14 }
  0xcf   : > { %v379_v17 = vadd.s32 8, %v378_v16  ;;  %v384_v19 = vadd.s32 %v383_v15, %v378_v16 }
  0xd1   : > { %v385_v20 = vadd.s32 %v383_v15, %v379_v17  ;;  %v386_v21 = vmul.u32 128, %v384_v19 }
  0xd3   : > { %v387_v22 = vmul.u32 128, %v385_v20  ;;  %v388_v23 = vadd.s32 %v386_v21, %v381_v18 }
  0xd5   : > { %v389_v24 = vadd.s32 %v387_v22, %v381_v18  ;;  %vm390_vm12 = vcmp.lt.s32.totalorder %v388_v23, 5120 }
  0xd6   : > { %v392_v25 = vsel %vm390_vm12, %v363_v9, 0.0 }
  0xd7   : > { %vm391_vm13 = vcmp.lt.s32.totalorder %v389_v24, 5120 }
  0xd8   : > { %v393_v26 = vsel %vm391_vm13, %v364_v10, 0.0 }
  0xd9   : > { %v395_v28 = vadd.f32 %v393_v26, %v392_v25 }
  0xdb   : > { %v396_v29 = vadd.f32 %v395_v28, %v394_v27 }
  0xdd   : > { %397 = vst [vmem:[%s1120_s23] sm:$0xff] %v396_v29 }
  0xde PF: > { %s554_s3 = sshll.u32 %s865_s16, 3  ;;  %s411_s20 = sshll.u32 %s1120_s23, 4  ;;  %s412_s20 = int_to_ptr.vmem [resolvable:$true] %s411_s20 }
  0xdf   : > { %s409_s4 = scalar_lea.hbm %s1221_s2, %s554_s3  ;;  %s399_s28 = scalar_lea.sflag [#allocation4], %s253_s27 }
  0xe0   : > { %s413_s18 = sshll.u32 %s409_s4, 4  ;;  %s771_s16 = scalar_lea.hbm %s1221_s2, 16  ;;  %s414_s18 = int_to_ptr.hbm [resolvable:$true] %s413_s18 }
  0xe1   : > { %s765_s6 = sshra.s32 %s414_s18, 4  ;;  %s766_s6 = int_to_ptr.hbm [resolvable:$true] %s765_s6 }
  0xe2   : > { %s767_s21 = scalar_lea.hbm %s766_s6, 8  ;;  %p772_p6 = scmp.lt.s32.totalorder %s766_s6, %s1221_s2 }
  0xe3   : > { %p768_p0 = scmp.ne.s32.totalorder %s766_s6, %s767_s21  ;;  %p773_p8 = scmp.lt.s32.totalorder %s771_s16, %s767_s21 }
  0xe5   : > { %p769_p1 = pnand %p768_p0, %p1005_p2  ;;  %p774_p10 = por %p773_p8, %p772_p6 }
  0xe7   : > { %p770_p4 = pneg %p769_p1 }
  0xe9   : > { %p775_p7 = pnand %p774_p10, %p770_p4 }
  0xeb   : > { %778 = shalt.err (!%p775_p7)
}
  0xec   : > { %561 = dma.vmem_to_hbm [thread:$0]  (%p1005_p2), %s412_s20, 128, %s414_s18, %s399_s28  }
  0xed PF: > { %p567_p11 = scmp.ge.s32.totalorder %s877_s19, 2  ;;  %s425_s27 = sand.u32 1, %s837_s9  }
  0xee   : > { %s426_s30 = scalar_lea.sflag [#allocation4], %s425_s27 }
  0xef   : > { %p564_p12 = pnand %p567_p11, %p1009_p3 }
  0xf1   : > { %p565_p5 = pneg %p564_p12 }
  0xf3   : > { %832 = dma.done.wait (%p565_p5), %s426_s30, 128  }
  0xf4   : > { %834 = vsyncadd (%p565_p5), %s426_s30, 4294967168  ;;  %s21_s19 = sadd.s32 1, %s877_s19   ;;  %s1249_s8 = sld [smem:[#allocation15_spill]] }
  0xf5   : > { %p18_p9 = scmp.ge.s32.totalorder %s21_s19, 6   ;;  %s1250_s15 = sld [smem:[#allocation11_spill]] }
  0xf6   : > { %s1251_s16 = sld [smem:[#allocation12_spill]]  ;;  %s1254_s9 = smov %s841_s10 }
  0xf7   : > { %s1252_s17 = sld [smem:[#allocation13_spill]]  ;;  %s1255_s10 = smov %s845_s11 }
  0xf8   : > { %s1253_s18 = sld [smem:[#allocation14_spill]]  ;;  %s1256_s11 = smov %s991_s5 }
  0xf9   : > { %s1257_s12 = smov %s853_s13  ;;  %s1258_s13 = smov %s857_s14 }
  0xfa   : > { %s1259_s14 = smov %s1249_s8  ;;  %20 = sbr.rel (!%p18_p9) target bundleno = 13 (0xd), region = 98 }
  0xff   :  { %432 = vsyncpa [#allocation3], 1 }
 0x100   :  { %434 = vsyncpa [#allocation3 + $0x1], 1 }
 0x101   :  { %435 = vsyncpa [#allocation6], 1 }
 0x102   :  { %437 = vsyncpa [#allocation6 + $0x1], 1 }
 0x103   :  { %438 = vsyncpa [#allocation4], 1 }
 0x104   :  { %440 = vsyncpa [#allocation4 + $0x1], 1 }

</bundles_post_ra>
